<compile_context>
chip_gen: v5e
topology: v5e:2x2
jax: 0.10.0
libtpu: 0.0.40
codegen_flags: <defaults>
</compile_context>

<pallas_src>
import jax
import jax.numpy as jnp
from jax.experimental import pallas as pl
from jax.experimental.pallas import tpu as pltpu


def make_divisible_LC(v, divisor=8, min_value=None):
    if min_value is None:
        min_value = divisor
    new_v = max(min_value, int(v + divisor / 2) // divisor * divisor)
    if new_v < 0.9 * v:
        new_v += divisor
    return new_v


def _round_up(x, m):
    return (x + m - 1) // m * m


def _conv_matmul_kernel(p_ref, w_ref, o_ref):
    # p_ref: (TM, G*K)      bf16 grouped im2col patches (tile of grouped rows)
    # w_ref: (G*K, G*C_out) bf16 block-diagonal weight (resident: same block
    #                       every grid step, fetched once)
    # o_ref: (TM, G*C_out)  f32, lane-dense (128 lanes when C_out=16)
    o_ref[...] = jnp.dot(p_ref[...], w_ref[...],
                         preferred_element_type=jnp.float32)


_GROUP = 8          # output pixels packed per matmul row -> lane-dense stores
_DEFAULT_TM = 1024  # grouped-patch rows per tile (multiple of 8)


@jax.jit
def pplc_conv(x_nchw, weight):
    """Conv2d(3, C_out, k=3, s=2, p=1, bias=False), matching nn.Conv2d (NCHW)."""
    N, C_in, H, W = x_nchw.shape
    C_out, _, KH, KW = weight.shape
    stride, pad = 2, 1
    H_out = (H + 2 * pad - KH) // stride + 1
    W_out = (W + 2 * pad - KW) // stride + 1
    K = KH * KW * C_in
    M = N * H_out * W_out

    # ---- glue: NCHW -> NHWC, pad, im2col in bf16 ----
    # TODO(synk): fuse patch extraction into the kernel (tile padded NHWC rows
    # via BlockSpec and build the 9 shifted views in VMEM) to remove the
    # im2col HBM round-trip entirely.
    x = jnp.transpose(x_nchw, (0, 2, 3, 1)).astype(jnp.bfloat16)
    x = jnp.pad(x, ((0, 0), (pad, pad), (pad, pad), (0, 0)))
    cols = []
    for kh in range(KH):
        for kw in range(KW):
            cols.append(x[:, kh:kh + stride * H_out:stride,
                          kw:kw + stride * W_out:stride, :])
    patches = jnp.concatenate(cols, axis=-1).reshape(M, K)      # (M, K) bf16

    # ---- lane-dense grouping: G output pixels per matmul row ----
    G = _GROUP
    M_pad = _round_up(M, G)
    if M_pad != M:
        patches = jnp.pad(patches, ((0, M_pad - M), (0, 0)))
    Mg = M_pad // G
    patches_g = patches.reshape(Mg, G * K)                       # (Mg, G*K)

    # weight (C_out, C_in, KH, KW) -> (KH, KW, C_in, C_out) -> (K, C_out),
    # matching the (kh, kw, c_in) ordering of the im2col above.
    w_mat = jnp.transpose(weight, (2, 3, 1, 0)).reshape(K, C_out)
    w_mat = w_mat.astype(jnp.bfloat16)
    # Block-diagonal (G*K, G*C_out): column block g only sees pixel g's patch.
    eye_g = jnp.eye(G, dtype=jnp.bfloat16)
    w_big = (eye_g[:, None, :, None] * w_mat[None, :, None, :]).reshape(
        G * K, G * C_out)

    # ---- tile over grouped rows (double-buffered, parallel across TCs) ----
    TM = min(_DEFAULT_TM, _round_up(Mg, 8))
    Mg_pad = _round_up(Mg, TM)
    if Mg_pad != Mg:
        patches_g = jnp.pad(patches_g, ((0, Mg_pad - Mg), (0, 0)))
    n_tiles = Mg_pad // TM

    GK, GC = G * K, G * C_out
    cost = pl.CostEstimate(
        flops=2 * Mg_pad * GK * GC,
        transcendentals=0,
        bytes_accessed=2 * Mg_pad * GK + 2 * GK * GC + 4 * Mg_pad * GC)

    out_g = pl.pallas_call(
        _conv_matmul_kernel,
        out_shape=jax.ShapeDtypeStruct((Mg_pad, GC), jnp.float32),
        grid=(n_tiles,),
        in_specs=[pl.BlockSpec((TM, GK), lambda i: (i, 0)),
                  pl.BlockSpec((GK, GC), lambda i: (0, 0))],
        out_specs=pl.BlockSpec((TM, GC), lambda i: (i, 0)),
        compiler_params=pltpu.CompilerParams(
            dimension_semantics=("parallel",),
            vmem_limit_bytes=32 * 1024 * 1024),
        cost_estimate=cost,
    )(patches_g, w_big)

    # ungroup: (Mg_pad, G*C_out) -> (M, C_out) -> (N, H_out, W_out, C_out)
    out = out_g.reshape(Mg_pad * G, C_out)[:M]
    out = out.reshape(N, H_out, W_out, C_out)
    return jnp.transpose(out, (0, 3, 1, 2))        # NCHW, matching nn.Conv2d


if __name__ == "__main__":
    scale = 1.0
    C_out = make_divisible_LC(16 * scale)          # == 16

    key = jax.random.PRNGKey(0)
    kx, kw = jax.random.split(key)

    # Small deterministic input: batch=2, 3 input channels, 16x16 spatial.
    x = jax.random.normal(kx, (2, 3, 16, 16), dtype=jnp.float32)

    # Deterministic Conv2d weight init (kaiming-uniform style bounds),
    # shape (C_out, C_in=3, 3, 3) as in nn.Conv2d(3, C_out, 3, bias=False).
    fan_in = 3 * 3 * 3
    bound = 1.0 / (fan_in ** 0.5)
    weight = jax.random.uniform(kw, (C_out, 3, 3, 3), jnp.float32,
                                minval=-bound, maxval=bound)

    y = jax.block_until_ready(pplc_conv(x, weight))

    # Cross-check against the XLA reference convolution (same semantics as torch).
    ref = jax.lax.conv_general_dilated(
        x, weight, window_strides=(2, 2), padding=((1, 1), (1, 1)),
        dimension_numbers=("NCHW", "OIHW", "NCHW"))
    assert y.shape == ref.shape == (2, C_out, 8, 8)
    # bf16 inputs with f32 accumulation -> loosened tolerance vs f32 reference.
    assert jnp.allclose(y, ref, atol=5e-2, rtol=5e-2), \
        float(jnp.max(jnp.abs(y - ref)))

    print("KERNEL_OK")
</pallas_src>

<mosaic_0001>
module attributes {stable_mosaic.version = 11 : i64} {
  func.func @_conv_matmul_kernel(%arg0: i32, %arg1: memref<16x216xbf16, #tpu.memory_space<vmem>>, %arg2: memref<216x128xbf16, #tpu.memory_space<vmem>>, %arg3: memref<16x128xf32, #tpu.memory_space<vmem>>) attributes {dimension_semantics = [#tpu.dimension_semantics<parallel>], iteration_bounds = array<i64: 1>, scalar_prefetch = 0 : i64, scratch_operands = 0 : i64, tpu.core_type = #tpu.core_type<tc>, window_params = [{transform_indices = @transform_0, window_bounds = array<i64: 16, 216>}, {pipeline_mode = #tpu.pipeline_mode<synchronous>, transform_indices = @transform_1, window_bounds = array<i64: 216, 128>}, {transform_indices = @transform_2, window_bounds = array<i64: 16, 128>}]} {
    %c0 = arith.constant 0 : index
    %c0_0 = arith.constant 0 : index
    %0 = vector.load %arg1[%c0, %c0_0] : memref<16x216xbf16, #tpu.memory_space<vmem>>, vector<16x216xbf16>
    %c0_1 = arith.constant 0 : index
    %c0_2 = arith.constant 0 : index
    %1 = vector.load %arg2[%c0_1, %c0_2] : memref<216x128xbf16, #tpu.memory_space<vmem>>, vector<216x128xbf16>
    %cst = arith.constant dense<0.000000e+00> : vector<16x128xf32>
    %2 = tpu.matmul %0, %1, %cst {dimension_numbers = #tpu.dot_dimension_numbers<[1], [0], [0], [1], [0, 0, 1, 1], [], []>} : vector<16x216xbf16>, vector<216x128xbf16>, vector<16x128xf32> -> vector<16x128xf32>
    %c0_3 = arith.constant 0 : index
    %c0_4 = arith.constant 0 : index
    %3 = vector.load %arg3[%c0_3, %c0_4] : memref<16x128xf32, #tpu.memory_space<vmem>>, vector<16x128xf32>
    tpu.vector_store %arg3[%c0_3, %c0_4], %2 {strides = array<i32>} : memref<16x128xf32, #tpu.memory_space<vmem>>, vector<16x128xf32>,
    return
  }
  func.func @transform_0(%arg0: i32) -> (i32, i32) {
    %c0_i32 = arith.constant 0 : i32
    %c0_i32_0 = arith.constant 0 : i32
    return %arg0, %c0_i32 : i32, i32
  }
  func.func @transform_1(%arg0: i32) -> (i32, i32) {
    %c0_i32 = arith.constant 0 : i32
    %c0_i32_0 = arith.constant 0 : i32
    %c0_i32_1 = arith.constant 0 : i32
    return %c0_i32, %c0_i32_0 : i32, i32
  }
  func.func @transform_2(%arg0: i32) -> (i32, i32) {
    %c0_i32 = arith.constant 0 : i32
    %c0_i32_0 = arith.constant 0 : i32
    return %arg0, %c0_i32 : i32, i32
  }
}

</mosaic_0001>

<bundles_post_ra>
// kernel: pplc_conv.1
= control target key start
LH: loop header
LB: loop body
LE: loop exit
PB: predicated region body
PF: predicated region fallthrough
CT: control target
= control target key end

     0   :  { %vm135_vm0 = vcmask 1043456   ;;  %vm131_vm1 = vcmask 719872   ;;  %s324_s1 = inlined_call_operand.vmem [shape: bf16[216,128], index: 1, kind: input, shape index: {}]   ;;  %s325_s0 = inlined_call_operand.vmem [shape: bf16[16,216], index: 0, kind: input, shape index: {}]   ;;  %s326_s2 = inlined_call_operand.vmem [shape: f32[16,128], index: 2, kind: output, shape index: {}]  }
   0x1   :  { %v243_v0 = vld [vmem:[%s324_s1 + $0x38] sm:$0xff]  ;;  %v40_v1 = vld [vmem:[%s324_s1 + $0x68] sm:$0xf]  ;;  %v242_v3 = vld [vmem:[%s324_s1 + $0x30] sm:$0xff] }
   0x2   :  { %v103_v2 = vunpack.c.l.b16 %v40_v1  ;;  %139 = vmatpush.bf16.msra.mxu0 %v243_v0  ;;  %v248_v6 = vld [vmem:[%s324_s1 + $0x60] sm:$0xff]  ;;  %v241_v7 = vld [vmem:[%s324_s1 + $0x28] sm:$0xff]  ;;  %v247_v8 = vld [vmem:[%s324_s1 + $0x58] sm:$0xff] }
   0x3   :  { %v240_v9 = vld [vmem:[%s324_s1 + $0x20] sm:$0xff]  ;;  %v246_v10 = vld [vmem:[%s324_s1 + $0x50] sm:$0xff]  ;;  %v239_v11 = vld [vmem:[%s324_s1 + $0x18] sm:$0xff] }
   0x4   :  { %v117_v4 = vpack.c.b16 %v103_v2, %v103_v2  ;;  %v245_v12 = vld [vmem:[%s324_s1 + $0x48] sm:$0xff]  ;;  %v238_v13 = vld [vmem:[%s324_s1 + $0x10] sm:$0xff]  ;;  %v244_v14 = vld [vmem:[%s324_s1 + $0x40] sm:$0xff] }
   0x5   :  { %v237_v15 = vld [vmem:[%s324_s1 + $0x8] sm:$0xff]  ;;  %v234_v16 = vld [vmem:[%s325_s0 + $0x4] sm:$0xf]  ;;  %v175_v20 = vld [vmem:[%s325_s0] sm:$0xf] }
   0x6   :  { %v137_v5 = vsel %vm135_vm0, %v117_v4, 0  ;;  %140 = vmatpush.bf16.msra.mxu0 %v242_v3  ;;  %v177_v17 = vld [vmem:[%s325_s0 + $0x8] sm:$0xf0]  ;;  %v236_v19 = vld [vmem:[%s324_s1] sm:$0xff]  ;;  %v235_v21 = vld [vmem:[%s325_s0 + $0x4] sm:$0xf0] }
   0x7   :  { %155 = vmatpush.bf16.msra.mxu1 %v137_v5  ;;  %v180_v18 = vor.u32 %v234_v16, %v177_v17  ;;  %v176_v22 = vor.u32 %v235_v21, %v175_v20 }
   0xa   :  { %141 = vmatpush.bf16.msra.mxu0 %v241_v7 }
   0xb   :  { %156 = vmatpush.bf16.msra.mxu1 %v248_v6 }
   0xe   :  { %142 = vmatpush.bf16.msra.mxu0 %v240_v9 }
   0xf   :  { %157 = vmatpush.bf16.msra.mxu1 %v247_v8 }
  0x12   :  { %143 = vmatpush.bf16.msra.mxu0 %v239_v11 }
  0x13   :  { %158 = vmatpush.bf16.msra.mxu1 %v246_v10 }
  0x16   :  { %144 = vmatpush.bf16.msra.mxu0 %v238_v13 }
  0x17   :  { %159 = vmatpush.bf16.msra.mxu1 %v245_v12 }
  0x1a   :  { %145 = vmatpush.bf16.msra.mxu0 %v237_v15 }
  0x1b   :  { %160 = vmatpush.bf16.msra.mxu1 %v244_v14 }
  0x1e   :  { %233 = vmatmul.msk.bf16.vlgmr.msra.gmra.mxu1 %vm131_vm1, %v180_v18  ;;  %146 = vmatpush.bf16.msra.mxu0 %v236_v19 }
  0x21   :  { %147 = vmatmul.bf16.vlgmr.msra.gmra.mxu0 %v176_v22 }
  0x9b   :  { %v162_v23 = vpop.f32.mrf.mxu1 }
  0x9e   :  { %v148_v24 = vpop.f32.mrf.mxu0 }
  0x9f   :  { %v163_v25 = vadd.f32 %v162_v23, %v148_v24 }
  0xa1   :  { %167 = vst [vmem:[%s326_s2] sm:$0xff] %v163_v25 }
  0xa3   :  { %v164_v26 = vpop.f32.mrf.mxu1 }
  0xa6   :  { %v150_v27 = vpop.f32.mrf.mxu0 }
  0xa7   :  { %v165_v28 = vadd.f32 %v164_v26, %v150_v27 }
  0xa9   :  { %168 = vst [vmem:[%s326_s2 + $0x8] sm:$0xff] %v165_v28 }

</bundles_post_ra>
